<compile_context>
chip_gen: v5e
topology: v5e:2x2
jax: 0.10.0
libtpu: 0.0.40
codegen_flags: <defaults>
</compile_context>

<pallas_src>
import jax
import jax.numpy as jnp
from jax.experimental import pallas as pl
from jax.experimental.pallas import tpu as pltpu

_K = 3  # conv kernel size of the synthetic backbone


def _net_kernel(p_ref, wcf_ref, bc_ref, wfc_ref, bfc_ref, out_ref):
    """Fused backbone (conv3x3 + ReLU + GAP) + fc for a tile of BT images.

    p_ref   : (9*C, BT*HW)  im2col patches, pixels lane-dense
    wcf_ref : (F, 9*C)      conv weight, flattened taps on the contraction dim
    bc_ref  : (F, 1)        conv bias
    wfc_ref : (F, NCp)      fc weight (transposed, lane-padded, 1/HW folded in)
    bfc_ref : (1, NCp)      fc bias (lane-padded)
    out_ref : (BT, NCp)     lane-dense logits tile
    """
    BT = out_ref.shape[0]
    HW = p_ref.shape[1] // BT

    # conv3x3 as ONE fused K=9*C contraction, weight-stationary so the large
    # dimension (BT*HW) lands on lanes: (F, 9C) @ (9C, BT*HW) -> (F, BT*HW).
    act = jnp.dot(wcf_ref[...], p_ref[...], preferred_element_type=jnp.float32)
    act = jnp.maximum(act + bc_ref[...], 0.0)          # bias + ReLU (lane-dense VPU)

    # Global average pool: per-image lane reduction over aligned HW slices
    # (HW is a multiple of 128 here, so each slice stays in-layout).  The 1/HW
    # scale is folded into wfc on the host.  Static unroll over BT images.
    cols = [act[:, b * HW:(b + 1) * HW].sum(axis=1, keepdims=True)
            for b in range(BT)]                        # BT x (F, 1)
    feat = jnp.concatenate(cols, axis=1)               # (F, BT)

    # fc: (BT, F) @ (F, NCp) + bias -> unmasked lane-dense (BT, 128) store.
    out_ref[...] = (jnp.dot(feat.T, wfc_ref[...],
                            preferred_element_type=jnp.float32)
                    + bfc_ref[...])


def _pick_bt(batch, hw):
    """Images per grid step.

    Prefers >= 2 grid steps (keeps both v7x TensorCores busy on the 'parallel'
    axis) with BT a multiple of 8 (clean sublane tiling of the (BT, 128)
    output block), while capping the conv matmul lane width BT*HW so the
    padded input tile stays small inside VMEM.
    """
    max_lanes = 1 << 15                    # BT*HW <= 32768 lanes (~5 MiB f32 tile)
    for bt in (64, 32, 16, 8):
        if batch % bt == 0 and batch // bt >= 2 and bt * hw <= max_lanes:
            return bt
    return batch                           # tiny/odd batches: one full-batch step


def _pad2(shape):
    """Element count of a 2-D f32 buffer after (8, 128) layout padding."""
    sub = -(-shape[-2] // 8) * 8
    lane = -(-shape[-1] // 128) * 128
    return sub * lane


def net_forward(x, w_conv, b_conv, w_fc, b_fc):
    """x: (B, C, H, W) float32 (NCHW, like the PyTorch module)."""
    B, C, H, W = x.shape
    F = w_conv.shape[0]          # in_feats
    NC = w_fc.shape[0]           # num_class
    KK = _K * _K
    KKC = KK * C
    HW = H * W
    NCp = ((NC + 127) // 128) * 128          # lane-dense output width

    BT = _pick_bt(B, HW)
    assert B % BT == 0
    grid = (B // BT,)

    # ---- host-side glue: lane-dense weight-stationary im2col ----
    # patches[(i*3+j)*C + c, b*HW + h*W + w] = x_pad[b, c, h+i, w+j]
    x_pad = jnp.pad(x, ((0, 0), (0, 0), (1, 1), (1, 1)))            # (B,C,H+2,W+2)
    taps = [x_pad[:, :, i:i + H, j:j + W] for i in range(_K) for j in range(_K)]
    patches = jnp.stack(taps, axis=0)                                # (9,B,C,H,W)
    patches = jnp.transpose(patches, (0, 2, 1, 3, 4)).reshape(KKC, B * HW)

    # conv weight (F, C, 3, 3) -> (F, 9*C), columns ordered (tap, channel).
    wcf = jnp.transpose(w_conv, (0, 2, 3, 1)).reshape(F, KKC)
    bc = b_conv.reshape(F, 1)

    # fc weight/bias lane-padded to NCp; fold the 1/HW average-pool scale in.
    wfc = jnp.zeros((F, NCp), jnp.float32).at[:, :NC].set(w_fc.T / HW)
    bfc = jnp.zeros((1, NCp), jnp.float32).at[:, :NC].set(b_fc)

    # ---- padding-aware VMEM budget (capped well under v7x's 64 MiB) ----
    est_elems = (
        2 * (_pad2((KKC, BT * HW)) + _pad2((BT, NCp)))               # streamed, 2-buffered
        + 2 * (_pad2((F, KKC)) + _pad2((F, 1))
               + _pad2((F, NCp)) + _pad2((1, NCp)))                  # small residents
        + 2 * _pad2((F, BT * HW))                                    # pre/post-ReLU act
        + _pad2((F, BT)) + _pad2((BT, F))                            # pooled features
    )
    vmem_limit = int(min(32 * 2**20, max(16 * 2**20, 4 * 4 * est_elems)))

    cost = pl.CostEstimate(
        flops=2 * B * HW * KKC * F          # fused conv contraction
              + B * HW * F                  # average-pool adds
              + 2 * B * F * NCp,            # fc
        transcendentals=0,
        bytes_accessed=4 * (KKC * B * HW + F * KKC + F
                            + F * NCp + NCp + B * NCp),
    )

    out = pl.pallas_call(
        _net_kernel,
        out_shape=jax.ShapeDtypeStruct((B, NCp), jnp.float32),
        grid=grid,
        in_specs=[
            pl.BlockSpec((KKC, BT * HW), lambda b: (0, b)),   # patches tile (lane-dense)
            pl.BlockSpec((F, KKC), lambda b: (0, 0)),         # conv weight (resident)
            pl.BlockSpec((F, 1), lambda b: (0, 0)),           # conv bias
            pl.BlockSpec((F, NCp), lambda b: (0, 0)),         # fc weight (resident)
            pl.BlockSpec((1, NCp), lambda b: (0, 0)),         # fc bias
        ],
        out_specs=pl.BlockSpec((BT, NCp), lambda b: (b, 0)),
        compiler_params=pltpu.CompilerParams(
            dimension_semantics=("parallel",),
            vmem_limit_bytes=vmem_limit),
        cost_estimate=cost,
    )(patches, wcf, bc, wfc, bfc)

    return out[:, :NC]


def _reference(x, w_conv, b_conv, w_fc, b_fc):
    """Pure-JAX reference for the same synthetic Net."""
    conv = jax.lax.conv_general_dilated(
        x, w_conv, window_strides=(1, 1), padding="SAME",
        dimension_numbers=("NCHW", "OIHW", "NCHW"))
    conv = conv + b_conv[None, :, None, None]
    act = jnp.maximum(conv, 0.0)
    feat = act.mean(axis=(2, 3))                      # (B, F)
    return feat @ w_fc.T + b_fc[None, :]


if __name__ == "__main__":
    key = jax.random.PRNGKey(0)
    B, C, H, W = 16, 4, 16, 16            # 16 images -> BT=8, grid=(2,) parallel steps
    in_feats, num_class = 32, 10

    k1, k2, k3, k4, k5 = jax.random.split(key, 5)
    x = jax.random.normal(k1, (B, C, H, W), dtype=jnp.float32)
    # deterministic synthetic parameters (no checkpoint loading)
    w_conv = 0.1 * jax.random.normal(k2, (in_feats, C, 3, 3), dtype=jnp.float32)
    b_conv = 0.1 * jax.random.normal(k3, (in_feats,), dtype=jnp.float32)
    w_fc = 0.1 * jax.random.normal(k4, (num_class, in_feats), dtype=jnp.float32)
    b_fc = 0.1 * jax.random.normal(k5, (num_class,), dtype=jnp.float32)

    out = net_forward(x, w_conv, b_conv, w_fc, b_fc)
    jax.block_until_ready(out)

    ref = _reference(x, w_conv, b_conv, w_fc, b_fc)
    assert out.shape == (B, num_class)
    assert jnp.allclose(out, ref, atol=1e-4, rtol=1e-4), "mismatch vs reference"

    print("KERNEL_OK")
</pallas_src>

<mosaic_0001>
module attributes {stable_mosaic.version = 11 : i64} {
  func.func @_net_kernel(%arg0: i32, %arg1: memref<36x2048xf32, #tpu.memory_space<vmem>>, %arg2: memref<32x36xf32, #tpu.memory_space<vmem>>, %arg3: memref<32x1xf32, #tpu.memory_space<vmem>>, %arg4: memref<32x128xf32, #tpu.memory_space<vmem>>, %arg5: memref<1x128xf32, #tpu.memory_space<vmem>>, %arg6: memref<8x128xf32, #tpu.memory_space<vmem>>) attributes {dimension_semantics = [#tpu.dimension_semantics<parallel>], iteration_bounds = array<i64: 2>, scalar_prefetch = 0 : i64, scratch_operands = 0 : i64, tpu.core_type = #tpu.core_type<tc>, window_params = [{transform_indices = @transform_0, window_bounds = array<i64: 36, 2048>}, {pipeline_mode = #tpu.pipeline_mode<synchronous>, transform_indices = @transform_1, window_bounds = array<i64: 32, 36>}, {pipeline_mode = #tpu.pipeline_mode<synchronous>, transform_indices = @transform_2, window_bounds = array<i64: 32, 1>}, {pipeline_mode = #tpu.pipeline_mode<synchronous>, transform_indices = @transform_3, window_bounds = array<i64: 32, 128>}, {pipeline_mode = #tpu.pipeline_mode<synchronous>, transform_indices = @transform_4, window_bounds = array<i64: 1, 128>}, {transform_indices = @transform_5, window_bounds = array<i64: 8, 128>}]} {
    %c0 = arith.constant 0 : index
    %c0_0 = arith.constant 0 : index
    %0 = vector.load %arg2[%c0, %c0_0] : memref<32x36xf32, #tpu.memory_space<vmem>>, vector<32x36xf32>
    %c0_1 = arith.constant 0 : index
    %c0_2 = arith.constant 0 : index
    %1 = vector.load %arg1[%c0_1, %c0_2] : memref<36x2048xf32, #tpu.memory_space<vmem>>, vector<36x2048xf32>
    %cst = arith.constant dense<0.000000e+00> : vector<32x2048xf32>
    %2 = tpu.matmul %0, %1, %cst {dimension_numbers = #tpu.dot_dimension_numbers<[1], [0], [0], [1], [0, 0, 1, 1], [], []>} : vector<32x36xf32>, vector<36x2048xf32>, vector<32x2048xf32> -> vector<32x2048xf32>
    %c0_3 = arith.constant 0 : index
    %c0_4 = arith.constant 0 : index
    %3 = vector.load %arg3[%c0_3, %c0_4] : memref<32x1xf32, #tpu.memory_space<vmem>>, vector<32x1xf32>
    %4 = vector.broadcast %3 : vector<32x1xf32> to vector<32x2048xf32>
    %5 = arith.addf %2, %4 : vector<32x2048xf32>
    %cst_5 = arith.constant 0.000000e+00 : f32
    %6 = vector.broadcast %cst_5 : f32 to vector<32x2048xf32>
    %7 = arith.maximumf %5, %6 : vector<32x2048xf32>
    %8 = vector.extract_strided_slice %7 {offsets = [0, 0], sizes = [32, 256], strides = [1, 1]} : vector<32x2048xf32> to vector<32x256xf32>
    %cst_6 = arith.constant dense<0.000000e+00> : vector<32xf32>
    %9 = vector.multi_reduction <add>, %8, %cst_6 [1] : vector<32x256xf32> to vector<32xf32>
    %10 = vector.shape_cast %9 : vector<32xf32> to vector<32x1xf32>
    %11 = vector.extract_strided_slice %7 {offsets = [0, 256], sizes = [32, 256], strides = [1, 1]} : vector<32x2048xf32> to vector<32x256xf32>
    %cst_7 = arith.constant dense<0.000000e+00> : vector<32xf32>
    %12 = vector.multi_reduction <add>, %11, %cst_7 [1] : vector<32x256xf32> to vector<32xf32>
    %13 = vector.shape_cast %12 : vector<32xf32> to vector<32x1xf32>
    %14 = vector.extract_strided_slice %7 {offsets = [0, 512], sizes = [32, 256], strides = [1, 1]} : vector<32x2048xf32> to vector<32x256xf32>
    %cst_8 = arith.constant dense<0.000000e+00> : vector<32xf32>
    %15 = vector.multi_reduction <add>, %14, %cst_8 [1] : vector<32x256xf32> to vector<32xf32>
    %16 = vector.shape_cast %15 : vector<32xf32> to vector<32x1xf32>
    %17 = vector.extract_strided_slice %7 {offsets = [0, 768], sizes = [32, 256], strides = [1, 1]} : vector<32x2048xf32> to vector<32x256xf32>
    %cst_9 = arith.constant dense<0.000000e+00> : vector<32xf32>
    %18 = vector.multi_reduction <add>, %17, %cst_9 [1] : vector<32x256xf32> to vector<32xf32>
    %19 = vector.shape_cast %18 : vector<32xf32> to vector<32x1xf32>
    %20 = vector.extract_strided_slice %7 {offsets = [0, 1024], sizes = [32, 256], strides = [1, 1]} : vector<32x2048xf32> to vector<32x256xf32>
    %cst_10 = arith.constant dense<0.000000e+00> : vector<32xf32>
    %21 = vector.multi_reduction <add>, %20, %cst_10 [1] : vector<32x256xf32> to vector<32xf32>
    %22 = vector.shape_cast %21 : vector<32xf32> to vector<32x1xf32>
    %23 = vector.extract_strided_slice %7 {offsets = [0, 1280], sizes = [32, 256], strides = [1, 1]} : vector<32x2048xf32> to vector<32x256xf32>
    %cst_11 = arith.constant dense<0.000000e+00> : vector<32xf32>
    %24 = vector.multi_reduction <add>, %23, %cst_11 [1] : vector<32x256xf32> to vector<32xf32>
    %25 = vector.shape_cast %24 : vector<32xf32> to vector<32x1xf32>
    %26 = vector.extract_strided_slice %7 {offsets = [0, 1536], sizes = [32, 256], strides = [1, 1]} : vector<32x2048xf32> to vector<32x256xf32>
    %cst_12 = arith.constant dense<0.000000e+00> : vector<32xf32>
    %27 = vector.multi_reduction <add>, %26, %cst_12 [1] : vector<32x256xf32> to vector<32xf32>
    %28 = vector.shape_cast %27 : vector<32xf32> to vector<32x1xf32>
    %29 = vector.extract_strided_slice %7 {offsets = [0, 1792], sizes = [32, 256], strides = [1, 1]} : vector<32x2048xf32> to vector<32x256xf32>
    %cst_13 = arith.constant dense<0.000000e+00> : vector<32xf32>
    %30 = vector.multi_reduction <add>, %29, %cst_13 [1] : vector<32x256xf32> to vector<32xf32>
    %31 = vector.shape_cast %30 : vector<32xf32> to vector<32x1xf32>
    %32 = tpu.concatenate %10, %13, %16, %19, %22, %25, %28, %31 in 1 : vector<32x1xf32>, vector<32x1xf32>, vector<32x1xf32>, vector<32x1xf32>, vector<32x1xf32>, vector<32x1xf32>, vector<32x1xf32>, vector<32x1xf32> -> vector<32x8xf32>
    %33 = tpu.transpose %32, [1, 0] : vector<32x8xf32> -> vector<8x32xf32>
    %c0_14 = arith.constant 0 : index
    %c0_15 = arith.constant 0 : index
    %34 = vector.load %arg4[%c0_14, %c0_15] : memref<32x128xf32, #tpu.memory_space<vmem>>, vector<32x128xf32>
    %cst_16 = arith.constant dense<0.000000e+00> : vector<8x128xf32>
    %35 = tpu.matmul %33, %34, %cst_16 {dimension_numbers = #tpu.dot_dimension_numbers<[1], [0], [0], [1], [0, 0, 1, 1], [], []>} : vector<8x32xf32>, vector<32x128xf32>, vector<8x128xf32> -> vector<8x128xf32>
    %c0_17 = arith.constant 0 : index
    %c0_18 = arith.constant 0 : index
    %36 = vector.load %arg5[%c0_17, %c0_18] : memref<1x128xf32, #tpu.memory_space<vmem>>, vector<1x128xf32>
    %37 = vector.broadcast %36 : vector<1x128xf32> to vector<8x128xf32>
    %38 = arith.addf %35, %37 : vector<8x128xf32>
    %c0_19 = arith.constant 0 : index
    %c0_20 = arith.constant 0 : index
    %39 = vector.load %arg6[%c0_19, %c0_20] : memref<8x128xf32, #tpu.memory_space<vmem>>, vector<8x128xf32>
    tpu.vector_store %arg6[%c0_19, %c0_20], %38 {strides = array<i32>} : memref<8x128xf32, #tpu.memory_space<vmem>>, vector<8x128xf32>,
    return
  }
  func.func @transform_0(%arg0: i32) -> (i32, i32) {
    %c0_i32 = arith.constant 0 : i32
    %c0_i32_0 = arith.constant 0 : i32
    return %c0_i32, %arg0 : i32, i32
  }
  func.func @transform_1(%arg0: i32) -> (i32, i32) {
    %c0_i32 = arith.constant 0 : i32
    %c0_i32_0 = arith.constant 0 : i32
    %c0_i32_1 = arith.constant 0 : i32
    return %c0_i32, %c0_i32_0 : i32, i32
  }
  func.func @transform_2(%arg0: i32) -> (i32, i32) {
    %c0_i32 = arith.constant 0 : i32
    %c0_i32_0 = arith.constant 0 : i32
    %c0_i32_1 = arith.constant 0 : i32
    return %c0_i32, %c0_i32_0 : i32, i32
  }
  func.func @transform_3(%arg0: i32) -> (i32, i32) {
    %c0_i32 = arith.constant 0 : i32
    %c0_i32_0 = arith.constant 0 : i32
    %c0_i32_1 = arith.constant 0 : i32
    return %c0_i32, %c0_i32_0 : i32, i32
  }
  func.func @transform_4(%arg0: i32) -> (i32, i32) {
    %c0_i32 = arith.constant 0 : i32
    %c0_i32_0 = arith.constant 0 : i32
    %c0_i32_1 = arith.constant 0 : i32
    return %c0_i32, %c0_i32_0 : i32, i32
  }
  func.func @transform_5(%arg0: i32) -> (i32, i32) {
    %c0_i32 = arith.constant 0 : i32
    %c0_i32_0 = arith.constant 0 : i32
    return %arg0, %c0_i32 : i32, i32
  }
}

</mosaic_0001>

<bundles_post_ra>
// kernel: tpu_custom_call.1
= control target key start
LH: loop header
LB: loop body
LE: loop exit
PB: predicated region body
PF: predicated region fallthrough
CT: control target
= control target key end

     0   :  { %s2087_s0 = inlined_call_operand.hbm [shape: f32[36,4096], index: 0, kind: input, shape index: {}]   ;;  %s2088_s1 = inlined_call_operand.vmem [shape: f32[32,36], index: 1, kind: input, shape index: {}]   ;;  %s2089_s2 = inlined_call_operand.vmem [shape: f32[32,1], index: 2, kind: input, shape index: {}]   ;;  %s2090_s3 = inlined_call_operand.hbm [shape: f32[32,128], index: 3, kind: input, shape index: {}]   ;;  %s2091_s4 = inlined_call_operand.vmem [shape: f32[1,128], index: 4, kind: input, shape index: {}]   ;;  %s2092_s5 = inlined_call_operand.hbm [shape: f32[16,128], index: 5, kind: output, shape index: {}]  }
   0x1   :  { %2094 = sst [smem:[#allocation11_spill]] %s2090_s3 }
   0x2   :  { %10 = vsyncpa [#allocation3], 0 }
   0x3   :  { %12 = vsyncpa [#allocation3 + $0x1], 0 }
   0x4   :  { %13 = vsyncpa [#allocation6], 0 }
   0x5   :  { %14 = vsyncpa [#allocation4], 0 }
   0x6   :  { %16 = vsyncpa [#allocation4 + $0x1], 0  ;;  %s1584_s18 = smov 0   ;;  %s1586_s19 = smov 0  }
   0x7   :  { %s1588_s20 = smov 0   ;;  %s1590_s21 = smov 0  }
   0x8 LB: > { %s1605_s22 = sadd.s32 4294967295, %s1546_s21   ;;  %s1253_s23 = sadd.s32 4294967294, %s1546_s21   ;;  %s1546_s21 = sphi %s1590_s21, %s2106_s21   ;;  %s1542_s20 = sphi %s1588_s20, %s2105_s20   ;;  %s1538_s19 = sphi %s1586_s19, %s2104_s19   ;;  %s1534_s18 = sphi %s1584_s18, %s2103_s18  }
   0x9   : > { %p42_p0 = scmp.ne.s32.totalorder %s1538_s19, %s1534_s18  ;;  %p43_p1 = scmp.eq.s32.totalorder %s1605_s22, 0 }
   0xa   : > { %p150_p2 = scmp.eq.s32.totalorder %s1605_s22, 1  ;;  %p156_p3 = scmp.eq.s32.totalorder %s1253_s23, 1 }
   0xb   : > { %p1614_p4 = por %p43_p1, %p42_p0  ;;  %p1254_p5 = scmp.ge.s32.totalorder %s1546_s21, 1 }
   0xc   : > { %p1619_p6 = por %p156_p3, %p42_p0  ;;  %p163_p7 = scmp.lt.s32.totalorder %s1546_s21, 3 }
   0xd   : > { %s2097_s3 = sld [smem:[#allocation11_spill]]  ;;  %s1548_s30 = smov [#allocation5]  }
   0xe   : > { %p1627_p8 = pnand %p1254_p5, %p163_p7  ;;  %s182_s6 = sshll.u32 %s1548_s30, 4  ;;  %s183_s6 = int_to_ptr.vmem [resolvable:$true] %s182_s6 }
   0xf   : > { %s1637_s7 = sadd.s32 1, %s1546_s21   ;;  %s2093_s8 = smov 128  }
  0x10   : > { %p1358_p9 = pneg %p1627_p8  ;;  %s1550_s9 = smov 8  }
  0x11   : > { %s26_s10 = ssub.s32 %s1546_s21, %s1637_s7  ;;  %s29_s11 = sadd.s32 1, %s1542_s20 }
  0x12   : > { %p1359_p10 = pnand %p1358_p9, %p43_p1  ;;  %p27_p12 = scmp.eq.s32.totalorder %s26_s10, 0 }
  0x13   : > { %s180_s28 = sshll.u32 %s2097_s3, 4  ;;  %p36_p13 = scmp.ne.s32.totalorder %s1542_s20, %s1538_s19  ;;  %s181_s28 = int_to_ptr.hbm [resolvable:$true] %s180_s28 }
  0x14   : > { %1361 = dma.hbm_to_vmem [thread:$0]  (!%p1359_p10), %s181_s28, 512, %s183_s6, [#allocation6], %s2093_s8, %s2093_s8, %s1550_s9  }
  0x15   : > { %p37_p0 = scmp.eq.s32.totalorder %s1546_s21, 0  ;;  %p1371_p3 = scmp.lt.s32.totalorder %s1546_s21, 2 }
  0x16   : > { %s1649_s12 = scalar_select %p27_p12, %s1542_s20, %s29_s11  }
  0x17   : > { %p38_p5 = por %p37_p0, %p36_p13  ;;  %p1653_p7 = por %p150_p2, %p36_p13 }
  0x18   : > { %s199_s14 = sand.u32 1, %s1542_s20   ;;  %s1347_s15 = sshll.u32 %s1546_s21, 7 }
  0x19   : > { %s1348_s16 = smul.u32 640, %s199_s14  ;;  %s208_s26 = scalar_lea.hbm %s2087_s0, %s1347_s15 }
  0x1a   : > { %p1662_p9 = pnand %p1371_p3, %p38_p5  ;;  %s209_s28 = sshll.u32 %s208_s26, 4  ;;  %s210_s28 = int_to_ptr.hbm [resolvable:$true] %s209_s28 }
  0x1b   : > { %s203_s30 = scalar_lea.vmem [#allocation2], %s1348_s16  ;;  %s200_s9 = scalar_lea.sflag [#allocation3], %s199_s14 }
  0x1c   : > { %s211_s6 = sshll.u32 %s203_s30, 4  ;;  %s1446_s10 = sshra.s32 %s210_s28, 4  ;;  %s212_s6 = int_to_ptr.vmem [resolvable:$true] %s211_s6  ;;  %s1447_s10 = int_to_ptr.hbm [resolvable:$true] %s1446_s10 }
  0x1d   : > { %s1448_s11 = scalar_lea.hbm %s1447_s10, 640  ;;  %p1450_p10 = pneg %p1662_p9 }
  0x1e   : > { %p1449_p2 = scmp.ne.s32.totalorder %s1447_s10, %s1448_s11  ;;  %s1453_s23 = scalar_lea.hbm %s2087_s0, 1280 }
  0x1f   : > { %p1454_p0 = scmp.lt.s32.totalorder %s1447_s10, %s2087_s0  ;;  %p1455_p3 = scmp.lt.s32.totalorder %s1453_s23, %s1448_s11 }
  0x20   : > { %p1451_p12 = pnand %p1450_p10, %p1449_p2 }
  0x21   : > { %p1456_p5 = por %p1455_p3, %p1454_p0 }
  0x22   : > { %p1452_p13 = pneg %p1451_p12 }
  0x24   : > { %p1457_p11 = pnand %p1456_p5, %p1452_p13 }
  0x26   : > { %1460 = shalt.err (!%p1457_p11)
}
  0x27   : > { %s1551_s14 = smov 4096   ;;  %s1552_s16 = smov 2048  }
  0x28   : > { %s2101_s26 = smov 128   ;;  %223 = sbr.rel (%p1627_p8) target bundleno = 709 (0x2c5), region = 40 }
  0x29   : > { %1365 = dma.hbm_to_vmem [thread:$0]  (!%p1662_p9), %s210_s28, 10240, %s212_s6, %s200_s9, %s1551_s14, %s1552_s16, %s2101_s26  }
  0x2a   : > { %s1680_s30 = sand.u32 (!%p1627_p8), 1, %s1538_s19  }
  0x2b   : > { %s1349_s3 = smul.u32 (!%p1627_p8), 640, %s1680_s30  ;;  %s226_s8 = scalar_lea.sflag (!%p1627_p8), [#allocation3], %s1680_s30 }
  0x2d   : > { %s1684_s10 = scalar_lea.vmem [#allocation2], %s1349_s3 }
  0x2e   : > { %1521 = dma.done.wait (%p1614_p4), %s226_s8, 10240  }
  0x2f   : > { %1523 = vsyncadd (%p1614_p4), %s226_s8, 4294957056 }
  0x30   : > { %1525 = dma.done.wait (%p43_p1), [#allocation6], 512  }
  0x31   : > { %1527 = vsyncadd (%p43_p1), [#allocation6], 4294966784  ;;  %v1553_v0 = vmov 0   ;;  %vm384_vm0 = vcmask 1043456   ;;  %v331_v1 = vld [vmem:[%s1684_s10 + $0x200] sm:$0xf] }
  0x32   : > { %1413 = vset.pattern.permute.xlu0 %v1553_v0  ;;  %1414 = vset.pattern.permute.xlu1 %v1553_v0  ;;  %v332_v2 = vld [vmem:[%s1684_s10 + $0x208] sm:$0xf]  ;;  %v333_v3 = vld [vmem:[%s1684_s10 + $0x210] sm:$0xf]  ;;  %v334_v4 = vld [vmem:[%s1684_s10 + $0x218] sm:$0xf] }
  0x33   : > { %1262 = vmatpush.msk.msra.mxu0 %vm384_vm0, %v331_v1  ;;  %1267 = vmatpush.msk.msra.mxu1 %vm384_vm0, %v332_v2  ;;  %v315_v5 = vld [vmem:[%s1684_s10 + $0x180] sm:$0xff]  ;;  %v316_v6 = vld [vmem:[%s1684_s10 + $0x188] sm:$0xff]  ;;  %v317_v7 = vld [vmem:[%s1684_s10 + $0x190] sm:$0xff]  ;;  %vm371_vm1 = vcmask 293888   ;;  %vm1057_vm2 = vcmask 7168   ;;  %vm1062_vm3 = vcmask 15360  }
  0x34   : > { %1272 = vmatpush.msk.msra.mxu2 %vm384_vm0, %v333_v3  ;;  %1277 = vmatpush.msk.msra.mxu3 %vm384_vm0, %v334_v4  ;;  %v318_v8 = vld [vmem:[%s1684_s10 + $0x198] sm:$0xff]  ;;  %v299_v9 = vld [vmem:[%s1684_s10 + $0x100] sm:$0xff]  ;;  %v300_v10 = vld [vmem:[%s1684_s10 + $0x108] sm:$0xff]  ;;  %vm1067_vm4 = vcmask 23552   ;;  %vm1072_vm5 = vcmask 31744   ;;  %vm1077_vm6 = vcmask 39936  }
  0x35   : > { %445 = vmatpush.msra.mxu0 %v315_v5  ;;  %474 = vmatpush.msra.mxu1 %v316_v6  ;;  %v301_v11 = vld [vmem:[%s1684_s10 + $0x110] sm:$0xff]  ;;  %v302_v12 = vld [vmem:[%s1684_s10 + $0x118] sm:$0xff]  ;;  %v283_v13 = vld [vmem:[%s1684_s10 + $0x80] sm:$0xff]  ;;  %vm1082_vm7 = vcmask 48128   ;;  %vm1087_vm8 = vcmask 56320   ;;  %vm1132_vm9 = vcmask 261120  }
  0x36   : > { %503 = vmatpush.msra.mxu2 %v317_v7  ;;  %532 = vmatpush.msra.mxu3 %v318_v8  ;;  %v284_v14 = vld [vmem:[%s1684_s10 + $0x88] sm:$0xff]  ;;  %v285_v15 = vld [vmem:[%s1684_s10 + $0x90] sm:$0xff]  ;;  %v286_v16 = vld [vmem:[%s1684_s10 + $0x98] sm:$0xff]  ;;  %s1344_s29 = sshll.u32 %s1605_s22, 3  ;;  %s1158_s14 = scalar_lea.sflag [#allocation4], %s1680_s30 }
  0x37   : > { %446 = vmatpush.msra.mxu0 %v299_v9  ;;  %475 = vmatpush.msra.mxu1 %v300_v10  ;;  %v267_v17 = vld [vmem:[%s1684_s10] sm:$0xff]  ;;  %v268_v18 = vld [vmem:[%s1684_s10 + $0x8] sm:$0xff]  ;;  %v269_v19 = vld [vmem:[%s1684_s10 + $0x10] sm:$0xff]  ;;  %s1168_s6 = scalar_lea.hbm %s2092_s5, %s1344_s29  ;;  %s1496_s8 = scalar_lea.hbm %s2092_s5, 16 }
  0x38   : > { %504 = vmatpush.msra.mxu2 %v301_v11  ;;  %533 = vmatpush.msra.mxu3 %v302_v12  ;;  %v270_v20 = vld [vmem:[%s1684_s10 + $0x18] sm:$0xff]  ;;  %v1721_v21 = vld [vmem:[%s2088_s1] sm:$0xff]  ;;  %v337_v22 = vld [vmem:[%s1684_s10 + $0x230] sm:$0xf]  ;;  %s1172_s23 = sshll.u32 %s1168_s6, 4  ;;  %s1173_s23 = int_to_ptr.hbm [resolvable:$true] %s1172_s23 }
  0x39   : > { %447 = vmatpush.msra.mxu0 %v283_v13  ;;  %476 = vmatpush.msra.mxu1 %v284_v14  ;;  %v338_v23 = vld [vmem:[%s1684_s10 + $0x238] sm:$0xf]  ;;  %v335_v24 = vld [vmem:[%s1684_s10 + $0x220] sm:$0xf]  ;;  %v336_v25 = vld [vmem:[%s1684_s10 + $0x228] sm:$0xf] }
  0x3a   : > { %505 = vmatpush.msra.mxu2 %v285_v15  ;;  %534 = vmatpush.msra.mxu3 %v286_v16  ;;  %v321_v26 = vld [vmem:[%s1684_s10 + $0x1b0] sm:$0xff]  ;;  %v322_v27 = vld [vmem:[%s1684_s10 + $0x1b8] sm:$0xff]  ;;  %v347_v28 = vld [vmem:[%s2089_s2] sm:$0xff]  ;;  %s1490_s16 = sshra.s32 %s1173_s23, 4  ;;  %s1491_s16 = int_to_ptr.hbm [resolvable:$true] %s1490_s16 }
  0x3b   : > { %448 = vmatpush.msra.mxu0 %v267_v17  ;;  %477 = vmatpush.msra.mxu1 %v268_v18  ;;  %v319_v29 = vld [vmem:[%s1684_s10 + $0x1a0] sm:$0xff]  ;;  %v320_v30 = vld [vmem:[%s1684_s10 + $0x1a8] sm:$0xff]  ;;  %v305_v31 = vld [vmem:[%s1684_s10 + $0x130] sm:$0xff]  ;;  %s1492_s22 = scalar_lea.hbm %s1491_s16, 8  ;;  %p1497_p11 = scmp.lt.s32.totalorder %s1491_s16, %s2092_s5 }
  0x3c   : > { %506 = vmatpush.msra.mxu2 %v269_v19  ;;  %535 = vmatpush.msra.mxu3 %v270_v20  ;;  %v306_v32 = vld [vmem:[%s1684_s10 + $0x138] sm:$0xff]  ;;  %v303_v33 = vld [vmem:[%s1684_s10 + $0x120] sm:$0xff]  ;;  %v1752_v34 = vld [vmem:[%s2088_s1 + $0x8] sm:$0xff]  ;;  %p1493_p1 = scmp.ne.s32.totalorder %s1491_s16, %s1492_s22  ;;  %p1498_p9 = scmp.lt.s32.totalorder %s1496_s8, %s1492_s22 }
  0x3d   : > { %1263 = vmatmul.msk.f32.vlgmr.msra.gmra.mxu0 %vm371_vm1, %v1721_v21  ;;  %1268 = vmatmul.msk.f32.vlgmr.msra.gmra.mxu1 %vm371_vm1, %v1721_v21  ;;  %v304_v35 = vld [vmem:[%s1684_s10 + $0x128] sm:$0xff]  ;;  %v289_v36 = vld [vmem:[%s1684_s10 + $0xb0] sm:$0xff]  ;;  %v290_v37 = vld [vmem:[%s1684_s10 + $0xb8] sm:$0xff] }
  0x3e   : > { %1273 = vmatmul.msk.f32.vlgmr.msra.gmra.mxu2 %vm371_vm1, %v1721_v21  ;;  %1278 = vmatmul.msk.f32.vlgmr.msra.gmra.mxu3 %vm371_vm1, %v1721_v21  ;;  %v287_v38 = vld [vmem:[%s1684_s10 + $0xa0] sm:$0xff]  ;;  %v288_v39 = vld [vmem:[%s1684_s10 + $0xa8] sm:$0xff]  ;;  %v273_v40 = vld [vmem:[%s1684_s10 + $0x30] sm:$0xff]  ;;  %p1494_p4 = pnand %p1493_p1, %p1653_p7  ;;  %p1499_p2 = por %p1498_p9, %p1497_p11 }
  0x3f   : > { %1292 = vmatpush.msk.msrb.mxu2 %vm384_vm0, %v337_v22  ;;  %1297 = vmatpush.msk.msrb.mxu3 %vm384_vm0, %v338_v23  ;;  %v348_v41 = vld [vmem:[%s2089_s2 + $0x8] sm:$0xff]  ;;  %v274_v42 = vld [vmem:[%s1684_s10 + $0x38] sm:$0xff]  ;;  %v349_v43 = vld [vmem:[%s2089_s2 + $0x10] sm:$0xff] }
  0x40   : > { %1282 = vmatpush.msk.msrb.mxu0 %vm384_vm0, %v335_v24  ;;  %1287 = vmatpush.msk.msrb.mxu1 %vm384_vm0, %v336_v25  ;;  %v271_v44 = vld [vmem:[%s1684_s10 + $0x20] sm:$0xff]  ;;  %v272_v45 = vld [vmem:[%s1684_s10 + $0x28] sm:$0xff]  ;;  %v341_v46 = vld [vmem:[%s1684_s10 + $0x250] sm:$0xf]  ;;  %p1495_p8 = pneg %p1494_p4 }
  0x41   : > { %619 = vmatpush.msrb.mxu2 %v321_v26  ;;  %648 = vmatpush.msrb.mxu3 %v322_v27  ;;  %v1781_v47 = vld [vmem:[%s2088_s1 + $0x10] sm:$0xff]  ;;  %v342_v48 = vld [vmem:[%s1684_s10 + $0x258] sm:$0xf]  ;;  %v339_v49 = vld [vmem:[%s1684_s10 + $0x240] sm:$0xf] }
  0x42   : > { %353 = vperm.xlu0 %1413, %v347_v28   ;;  %561 = vmatpush.msrb.mxu0 %v319_v29  ;;  %v340_v50 = vld [vmem:[%s1684_s10 + $0x248] sm:$0xf]  ;;  %v325_v51 = vld [vmem:[%s1684_s10 + $0x1d0] sm:$0xff]  ;;  %v326_v52 = vld [vmem:[%s1684_s10 + $0x1d8] sm:$0xff]  ;;  %p1500_p10 = pnand %p1499_p2, %p1495_p8 }
  0x43   : > { %590 = vmatpush.msrb.mxu1 %v320_v30  ;;  %620 = vmatpush.msrb.mxu2 %v305_v31  ;;  %v323_v53 = vld [vmem:[%s1684_s10 + $0x1c0] sm:$0xff]  ;;  %v324_v54 = vld [vmem:[%s1684_s10 + $0x1c8] sm:$0xff]  ;;  %v309_v55 = vld [vmem:[%s1684_s10 + $0x150] sm:$0xff] }
  0x44   : > { %649 = vmatpush.msrb.mxu3 %v306_v32  ;;  %562 = vmatpush.msrb.mxu0 %v303_v33  ;;  %v350_v56 = vld [vmem:[%s2089_s2 + $0x18] sm:$0xff]  ;;  %v307_v58 = vld [vmem:[%s1684_s10 + $0x140] sm:$0xff]  ;;  %v308_v59 = vld [vmem:[%s1684_s10 + $0x148] sm:$0xff] }
  0x45   : > { %1264 = vmatmul.msk.f32.gmra.mxu0 %vm371_vm1, %v1752_v34  ;;  %1269 = vmatmul.msk.f32.gmra.mxu1 %vm371_vm1, %v1752_v34  ;;  %v310_v57 = vld [vmem:[%s1684_s10 + $0x158] sm:$0xff]  ;;  %v293_v61 = vld [vmem:[%s1684_s10 + $0xd0] sm:$0xff]  ;;  %v291_v63 = vld [vmem:[%s1684_s10 + $0xc0] sm:$0xff] }
  0x46   : > { %1274 = vmatmul.msk.f32.gmra.mxu2 %vm371_vm1, %v1752_v34  ;;  %1279 = vmatmul.msk.f32.gmra.mxu3 %vm371_vm1, %v1752_v34  ;;  %v1812_v60 = vld [vmem:[%s2088_s1 + $0x18] sm:$0xff]  ;;  %v292_v0 = vld [vmem:[%s1684_s10 + $0xc8] sm:$0xff]  ;;  %v277_v1 = vld [vmem:[%s1684_s10 + $0x50] sm:$0xff] }
  0x47   : > { %591 = vmatpush.msrb.mxu1 %v304_v35  ;;  %621 = vmatpush.msrb.mxu2 %v289_v36  ;;  %v294_v62 = vld [vmem:[%s1684_s10 + $0xd8] sm:$0xff]  ;;  %v275_v3 = vld [vmem:[%s1684_s10 + $0x40] sm:$0xff]  ;;  %v276_v4 = vld [vmem:[%s1684_s10 + $0x48] sm:$0xff] }
  0x48   : > { %650 = vmatpush.msrb.mxu3 %v290_v37  ;;  %563 = vmatpush.msrb.mxu0 %v287_v38  ;;  %v278_v2 = vld [vmem:[%s1684_s10 + $0x58] sm:$0xff]  ;;  %v345_v5 = vld [vmem:[%s1684_s10 + $0x270] sm:$0xf]  ;;  %v343_v7 = vld [vmem:[%s1684_s10 + $0x260] sm:$0xf] }
  0x49   : > { %592 = vmatpush.msrb.mxu1 %v288_v39  ;;  %622 = vmatpush.msrb.mxu2 %v273_v40  ;;  %v346_v6 = vld [vmem:[%s1684_s10 + $0x278] sm:$0xf]  ;;  %v344_v8 = vld [vmem:[%s1684_s10 + $0x268] sm:$0xf]  ;;  %v329_v9 = vld [vmem:[%s1684_s10 + $0x1f0] sm:$0xff] }
  0x4a   : > { %358 = vperm.xlu0 %1413, %v348_v41   ;;  %651 = vmatpush.msrb.mxu3 %v274_v42  ;;  %v330_v10 = vld [vmem:[%s1684_s10 + $0x1f8] sm:$0xff]  ;;  %v327_v11 = vld [vmem:[%s1684_s10 + $0x1e0] sm:$0xff]  ;;  %v328_v12 = vld [vmem:[%s1684_s10 + $0x1e8] sm:$0xff] }
  0x4b   : > { %363 = vperm.xlu1 %1414, %v349_v43   ;;  %564 = vmatpush.msrb.mxu0 %v271_v44  ;;  %v313_v13 = vld [vmem:[%s1684_s10 + $0x170] sm:$0xff]  ;;  %v314_v14 = vld [vmem:[%s1684_s10 + $0x178] sm:$0xff]  ;;  %v311_v15 = vld [vmem:[%s1684_s10 + $0x160] sm:$0xff] }
  0x4c   : > { %593 = vmatpush.msrb.mxu1 %v272_v45  ;;  %1312 = vmatpush.msk.msra.mxu2 %vm384_vm0, %v341_v46  ;;  %v312_v16 = vld [vmem:[%s1684_s10 + $0x168] sm:$0xff]  ;;  %v297_v17 = vld [vmem:[%s1684_s10 + $0xf0] sm:$0xff]  ;;  %v298_v18 = vld [vmem:[%s1684_s10 + $0xf8] sm:$0xff] }
  0x4d   : > { %1265 = vmatmul.msk.f32.gmra.mxu0 %vm371_vm1, %v1781_v47  ;;  %1270 = vmatmul.msk.f32.gmra.mxu1 %vm371_vm1, %v1781_v47  ;;  %v295_v19 = vld [vmem:[%s1684_s10 + $0xe0] sm:$0xff]  ;;  %v296_v20 = vld [vmem:[%s1684_s10 + $0xe8] sm:$0xff]  ;;  %v281_v22 = vld [vmem:[%s1684_s10 + $0x70] sm:$0xff] }
  0x4e   : > { %1275 = vmatmul.msk.f32.gmra.mxu2 %vm371_vm1, %v1781_v47  ;;  %1280 = vmatmul.msk.f32.gmra.mxu3 %vm371_vm1, %v1781_v47  ;;  %v282_v23 = vld [vmem:[%s1684_s10 + $0x78] sm:$0xff]  ;;  %v279_v24 = vld [vmem:[%s1684_s10 + $0x60] sm:$0xff]  ;;  %v280_v25 = vld [vmem:[%s1684_s10 + $0x68] sm:$0xff]  ;;  %s1261_s10 = sshll.u32 %s1680_s30, 3 }
  0x4f   : > { %1317 = vmatpush.msk.msra.mxu3 %vm384_vm0, %v342_v48  ;;  %1302 = vmatpush.msk.msra.mxu0 %vm384_vm0, %v339_v49  ;;  %s261_s15 = scalar_lea.vmem [#allocation7], %s1261_s10 }
  0x50   : > { %1307 = vmatpush.msk.msra.mxu1 %vm384_vm0, %v340_v50  ;;  %735 = vmatpush.msra.mxu2 %v325_v51  ;;  %s1170_s17 = sshll.u32 %s261_s15, 4  ;;  %s1171_s17 = int_to_ptr.vmem [resolvable:$true] %s1170_s17 }
  0x51   : > { %764 = vmatpush.msra.mxu3 %v326_v52  ;;  %677 = vmatpush.msra.mxu0 %v323_v53 }
  0x52   : > { %706 = vmatpush.msra.mxu1 %v324_v54  ;;  %736 = vmatpush.msra.mxu2 %v309_v55 }
  0x53   : > { %368 = vperm.xlu1 %1414, %v350_v56   ;;  %765 = vmatpush.msra.mxu3 %v310_v57 }
  0x54   : > { %678 = vmatpush.msra.mxu0 %v307_v58  ;;  %707 = vmatpush.msra.mxu1 %v308_v59 }
  0x55   : > { %1266 = vmatmul.msk.f32.gmra.mxu0 %vm371_vm1, %v1812_v60  ;;  %1271 = vmatmul.msk.f32.gmra.mxu1 %vm371_vm1, %v1812_v60 }
  0x56   : > { %1276 = vmatmul.msk.f32.gmra.mxu2 %vm371_vm1, %v1812_v60  ;;  %1281 = vmatmul.msk.f32.gmra.mxu3 %vm371_vm1, %v1812_v60 }
  0x57   : > { %737 = vmatpush.msra.mxu2 %v293_v61  ;;  %766 = vmatpush.msra.mxu3 %v294_v62 }
  0x58   : > { %679 = vmatpush.msra.mxu0 %v291_v63  ;;  %708 = vmatpush.msra.mxu1 %v292_v0 }
  0x59   : > { %738 = vmatpush.msra.mxu2 %v277_v1  ;;  %767 = vmatpush.msra.mxu3 %v278_v2 }
  0x5a   : > { %680 = vmatpush.msra.mxu0 %v275_v3  ;;  %709 = vmatpush.msra.mxu1 %v276_v4 }
  0x5d   : > { %1283 = vmatmul.msk.f32.vlgmr.msrb.gmra.mxu0 %vm371_vm1, %v1721_v21  ;;  %1288 = vmatmul.msk.f32.vlgmr.msrb.gmra.mxu1 %vm371_vm1, %v1721_v21 }
  0x5e   : > { %1293 = vmatmul.msk.f32.vlgmr.msrb.gmra.mxu2 %vm371_vm1, %v1721_v21  ;;  %1298 = vmatmul.msk.f32.vlgmr.msrb.gmra.mxu3 %vm371_vm1, %v1721_v21 }
  0x5f   : > { %1332 = vmatpush.msk.msrb.mxu2 %vm384_vm0, %v345_v5  ;;  %1337 = vmatpush.msk.msrb.mxu3 %vm384_vm0, %v346_v6 }
  0x60   : > { %1322 = vmatpush.msk.msrb.mxu0 %vm384_vm0, %v343_v7  ;;  %1327 = vmatpush.msk.msrb.mxu1 %vm384_vm0, %v344_v8 }
  0x61   : > { %851 = vmatpush.msrb.mxu2 %v329_v9  ;;  %880 = vmatpush.msrb.mxu3 %v330_v10 }
  0x62   : > { %793 = vmatpush.msrb.mxu0 %v327_v11  ;;  %822 = vmatpush.msrb.mxu1 %v328_v12 }
  0x63   : > { %852 = vmatpush.msrb.mxu2 %v313_v13  ;;  %881 = vmatpush.msrb.mxu3 %v314_v14 }
  0x64   : > { %794 = vmatpush.msrb.mxu0 %v311_v15  ;;  %823 = vmatpush.msrb.mxu1 %v312_v16 }
  0x65   : > { %1284 = vmatmul.msk.f32.gmra.mxu0 %vm371_vm1, %v1752_v34  ;;  %1289 = vmatmul.msk.f32.gmra.mxu1 %vm371_vm1, %v1752_v34 }
  0x66   : > { %1294 = vmatmul.msk.f32.gmra.mxu2 %vm371_vm1, %v1752_v34  ;;  %1299 = vmatmul.msk.f32.gmra.mxu3 %vm371_vm1, %v1752_v34 }
  0x67   : > { %853 = vmatpush.msrb.mxu2 %v297_v17  ;;  %882 = vmatpush.msrb.mxu3 %v298_v18 }
  0x68   : > { %795 = vmatpush.msrb.mxu0 %v295_v19  ;;  %824 = vmatpush.msrb.mxu1 %v296_v20 }
  0x69   : > { %854 = vmatpush.msrb.mxu2 %v281_v22  ;;  %883 = vmatpush.msrb.mxu3 %v282_v23 }
  0x6a   : > { %796 = vmatpush.msrb.mxu0 %v279_v24  ;;  %825 = vmatpush.msrb.mxu1 %v280_v25 }
  0x6d   : > { %1285 = vmatmul.msk.f32.gmra.mxu0 %vm371_vm1, %v1781_v47  ;;  %1290 = vmatmul.msk.f32.gmra.mxu1 %vm371_vm1, %v1781_v47 }
  0x6e   : > { %1295 = vmatmul.msk.f32.gmra.mxu2 %vm371_vm1, %v1781_v47  ;;  %1300 = vmatmul.msk.f32.gmra.mxu3 %vm371_vm1, %v1781_v47 }
  0x75   : > { %1286 = vmatmul.msk.f32.gmra.mxu0 %vm371_vm1, %v1812_v60  ;;  %1291 = vmatmul.msk.f32.gmra.mxu1 %vm371_vm1, %v1812_v60 }
  0x76   : > { %1296 = vmatmul.msk.f32.gmra.mxu2 %vm371_vm1, %v1812_v60  ;;  %1301 = vmatmul.msk.f32.gmra.mxu3 %vm371_vm1, %v1812_v60 }
  0x7d   : > { %1303 = vmatmul.msk.f32.vlgmr.msra.gmra.mxu0 %vm371_vm1, %v1721_v21  ;;  %1308 = vmatmul.msk.f32.vlgmr.msra.gmra.mxu1 %vm371_vm1, %v1721_v21 }
  0x7e   : > { %1313 = vmatmul.msk.f32.vlgmr.msra.gmra.mxu2 %vm371_vm1, %v1721_v21  ;;  %1318 = vmatmul.msk.f32.vlgmr.msra.gmra.mxu3 %vm371_vm1, %v1721_v21 }
  0x85   : > { %1304 = vmatmul.msk.f32.gmra.mxu0 %vm371_vm1, %v1752_v34  ;;  %1309 = vmatmul.msk.f32.gmra.mxu1 %vm371_vm1, %v1752_v34 }
  0x86   : > { %1314 = vmatmul.msk.f32.gmra.mxu2 %vm371_vm1, %v1752_v34  ;;  %1319 = vmatmul.msk.f32.gmra.mxu3 %vm371_vm1, %v1752_v34 }
  0x8d   : > { %1305 = vmatmul.msk.f32.gmra.mxu0 %vm371_vm1, %v1781_v47  ;;  %1310 = vmatmul.msk.f32.gmra.mxu1 %vm371_vm1, %v1781_v47 }
  0x8e   : > { %1315 = vmatmul.msk.f32.gmra.mxu2 %vm371_vm1, %v1781_v47  ;;  %1320 = vmatmul.msk.f32.gmra.mxu3 %vm371_vm1, %v1781_v47 }
  0x95   : > { %1306 = vmatmul.msk.f32.gmra.mxu0 %vm371_vm1, %v1812_v60  ;;  %1311 = vmatmul.msk.f32.gmra.mxu1 %vm371_vm1, %v1812_v60 }
  0x96   : > { %1316 = vmatmul.msk.f32.gmra.mxu2 %vm371_vm1, %v1812_v60  ;;  %1321 = vmatmul.msk.f32.gmra.mxu3 %vm371_vm1, %v1812_v60 }
  0x9d   : > { %1323 = vmatmul.msk.f32.vlgmr.msrb.gmra.mxu0 %vm371_vm1, %v1721_v21  ;;  %1328 = vmatmul.msk.f32.vlgmr.msrb.gmra.mxu1 %vm371_vm1, %v1721_v21 }
  0x9e   : > { %1333 = vmatmul.msk.f32.vlgmr.msrb.gmra.mxu2 %vm371_vm1, %v1721_v21  ;;  %1338 = vmatmul.msk.f32.vlgmr.msrb.gmra.mxu3 %vm371_vm1, %v1721_v21 }
  0xa5   : > { %1324 = vmatmul.msk.f32.gmra.mxu0 %vm371_vm1, %v1752_v34  ;;  %1329 = vmatmul.msk.f32.gmra.mxu1 %vm371_vm1, %v1752_v34 }
  0xa6   : > { %1334 = vmatmul.msk.f32.gmra.mxu2 %vm371_vm1, %v1752_v34  ;;  %1339 = vmatmul.msk.f32.gmra.mxu3 %vm371_vm1, %v1752_v34 }
  0xad   : > { %1325 = vmatmul.msk.f32.gmra.mxu0 %vm371_vm1, %v1781_v47  ;;  %1330 = vmatmul.msk.f32.gmra.mxu1 %vm371_vm1, %v1781_v47 }
  0xae   : > { %1335 = vmatmul.msk.f32.gmra.mxu2 %vm371_vm1, %v1781_v47  ;;  %1340 = vmatmul.msk.f32.gmra.mxu3 %vm371_vm1, %v1781_v47 }
  0xb4   : > { %v1950_v21 = vpop.permute.xlu0 %353 }
  0xb5   : > { %1326 = vmatmul.msk.f32.gmra.mxu0 %vm371_vm1, %v1812_v60  ;;  %1331 = vmatmul.msk.f32.gmra.mxu1 %vm371_vm1, %v1812_v60 }
  0xb6   : > { %1336 = vmatmul.msk.f32.gmra.mxu2 %vm371_vm1, %v1812_v60  ;;  %1341 = vmatmul.msk.f32.gmra.mxu3 %vm371_vm1, %v1812_v60 }
  0xba   : > { %v450_v26 = vpop.f32.mrf.mxu0  ;;  %v479_v27 = vpop.f32.mrf.mxu1 }
  0xbb   : > { %v451_v28 = vadd.f32 %v450_v26, %v1950_v21  ;;  %v480_v29 = vadd.f32 %v479_v27, %v1950_v21 }
  0xbc   : > { %v1956_v41 = vpop.permute.xlu0 %358 }
  0xbd   : > { %v897_v30 = vmax.f32 %v451_v28, 0.0  ;;  %v898_v31 = vmax.f32 %v480_v29, 0.0  ;;  %v1958_v42 = vpop.permute.xlu1 %363 }
  0xbf   : > { %v961_v32 = vadd.f32 %v898_v31, %v897_v30 }
  0xc1   : > { %v508_v33 = vpop.f32.mrf.mxu2  ;;  %v537_v34 = vpop.f32.mrf.mxu3  ;;  %962 = vadd.xlane.f32.xlu2 %v961_v32 }
  0xc2   : > { %v509_v35 = vadd.f32 %v508_v33, %v1950_v21  ;;  %v538_v36 = vadd.f32 %v537_v34, %v1950_v21  ;;  %v453_v37 = vpop.f32.mrf.mxu0  ;;  %v482_v38 = vpop.f32.mrf.mxu1 }
  0xc3   : > { %v454_v43 = vadd.f32 %v453_v37, %v1956_v41  ;;  %v483_v44 = vadd.f32 %v482_v38, %v1956_v41 }
  0xc4   : > { %v899_v39 = vmax.f32 %v509_v35, 0.0  ;;  %v900_v40 = vmax.f32 %v538_v36, 0.0 }
  0xc5   : > { %v913_v50 = vmax.f32 %v454_v43, 0.0  ;;  %v914_v51 = vmax.f32 %v483_v44, 0.0  ;;  %v1966_v60 = vpop.permute.xlu1 %368 }
  0xc6   : > { %v973_v45 = vadd.f32 %v900_v40, %v899_v39 }
  0xc7   : > { %v964_v58 = vadd.f32 %v914_v51, %v913_v50 }
  0xc9   : > { %v511_v46 = vpop.f32.mrf.mxu2  ;;  %v540_v47 = vpop.f32.mrf.mxu3  ;;  %974 = vadd.xlane.f32.xlu2 %v973_v45 }
  0xca   : > { %v456_v48 = vpop.f32.mrf.mxu0  ;;  %v485_v49 = vpop.f32.mrf.mxu1  ;;  %v512_v56 = vadd.f32 %v511_v46, %v1956_v41  ;;  %v541_v57 = vadd.f32 %v540_v47, %v1956_v41 }
  0xcb   : > { %v457_v52 = vadd.f32 %v456_v48, %v1958_v42  ;;  %v486_v53 = vadd.f32 %v485_v49, %v1958_v42 }
  0xcc   : > { %v915_v1 = vmax.f32 %v512_v56, 0.0  ;;  %v916_v2 = vmax.f32 %v541_v57, 0.0 }
  0xcd   : > { %v929_v54 = vmax.f32 %v457_v52, 0.0  ;;  %v930_v55 = vmax.f32 %v486_v53, 0.0 }
  0xce   : > { %v976_v10 = vadd.f32 %v916_v2, %v915_v1 }
  0xcf   : > { %v967_v59 = vadd.f32 %v930_v55, %v929_v54 }
  0xd1   : > { %v514_v61 = vpop.f32.mrf.mxu2  ;;  %v543_v62 = vpop.f32.mrf.mxu3  ;;  %965 = vadd.xlane.f32.xlu2 %v964_v58  ;;  %968 = vadd.xlane.f32.xlu1 %v967_v59 }
  0xd2   : > { %v459_v63 = vpop.f32.mrf.mxu0  ;;  %v488_v0 = vpop.f32.mrf.mxu1  ;;  %v515_v7 = vadd.f32 %v514_v61, %v1958_v42  ;;  %v544_v8 = vadd.f32 %v543_v62, %v1958_v42 }
  0xd3   : > { %v460_v3 = vadd.f32 %v459_v63, %v1966_v60  ;;  %v489_v4 = vadd.f32 %v488_v0, %v1966_v60 }
  0xd4   : > { %v931_v17 = vmax.f32 %v515_v7, 0.0  ;;  %v932_v18 = vmax.f32 %v544_v8, 0.0 }
  0xd5   : > { %v945_v5 = vmax.f32 %v460_v3, 0.0  ;;  %v946_v6 = vmax.f32 %v489_v4, 0.0 }
  0xd6   : > { %v979_v28 = vadd.f32 %v932_v18, %v931_v17 }
  0xd7   : > { %v970_v9 = vadd.f32 %v946_v6, %v945_v5 }
  0xd9   : > { %v517_v11 = vpop.f32.mrf.mxu2  ;;  %v546_v12 = vpop.f32.mrf.mxu3  ;;  %971 = vadd.xlane.f32.xlu0 %v970_v9  ;;  %977 = vadd.xlane.f32.xlu2 %v976_v10 }
  0xda   : > { %v518_v13 = vadd.f32 %v517_v11, %v1966_v60  ;;  %v547_v14 = vadd.f32 %v546_v12, %v1966_v60  ;;  %v566_v15 = vpop.f32.mrf.mxu0  ;;  %v595_v16 = vpop.f32.mrf.mxu1 }
  0xdb   : > { %v567_v19 = vadd.f32 %v566_v15, %v1950_v21  ;;  %v596_v20 = vadd.f32 %v595_v16, %v1950_v21 }
  0xdc   : > { %v947_v22 = vmax.f32 %v518_v13, 0.0  ;;  %v948_v23 = vmax.f32 %v547_v14, 0.0 }
  0xdd   : > { %v901_v24 = vmax.f32 %v567_v19, 0.0  ;;  %v902_v25 = vmax.f32 %v596_v20, 0.0 }
  0xde   : > { %v982_v26 = vadd.f32 %v948_v23, %v947_v22 }
  0xdf   : > { %v985_v27 = vadd.f32 %v902_v25, %v901_v24 }
  0xe0   : > { %983 = vadd.xlane.f32.xlu1 %v982_v26 }
  0xe1   : > { %v624_v29 = vpop.f32.mrf.mxu2  ;;  %v653_v30 = vpop.f32.mrf.mxu3  ;;  %986 = vadd.xlane.f32.xlu0 %v985_v27  ;;  %980 = vadd.xlane.f32.xlu2 %v979_v28 }
  0xe2   : > { %v625_v31 = vadd.f32 %v624_v29, %v1950_v21  ;;  %v654_v32 = vadd.f32 %v653_v30, %v1950_v21  ;;  %v569_v33 = vpop.f32.mrf.mxu0  ;;  %v598_v34 = vpop.f32.mrf.mxu1 }
  0xe3   : > { %v570_v35 = vadd.f32 %v569_v33, %v1956_v41  ;;  %v599_v36 = vadd.f32 %v598_v34, %v1956_v41 }
  0xe4   : > { %v903_v37 = vmax.f32 %v625_v31, 0.0  ;;  %v904_v38 = vmax.f32 %v654_v32, 0.0 }
  0xe5   : > { %v917_v39 = vmax.f32 %v570_v35, 0.0  ;;  %v918_v40 = vmax.f32 %v599_v36, 0.0 }
  0xe6   : > { %v997_v43 = vadd.f32 %v904_v38, %v903_v37 }
  0xe7   : > { %v988_v44 = vadd.f32 %v918_v40, %v917_v39 }
  0xe8   : > { %998 = vadd.xlane.f32.xlu1 %v997_v43 }
  0xe9   : > { %v627_v45 = vpop.f32.mrf.mxu2  ;;  %v656_v46 = vpop.f32.mrf.mxu3  ;;  %989 = vadd.xlane.f32.xlu2 %v988_v44 }
  0xea   : > { %v628_v47 = vadd.f32 %v627_v45, %v1956_v41  ;;  %v657_v48 = vadd.f32 %v656_v46, %v1956_v41  ;;  %v572_v49 = vpop.f32.mrf.mxu0  ;;  %v601_v50 = vpop.f32.mrf.mxu1 }
  0xeb   : > { %v573_v53 = vadd.f32 %v572_v49, %v1958_v42  ;;  %v602_v54 = vadd.f32 %v601_v50, %v1958_v42 }
  0xec   : > { %v919_v51 = vmax.f32 %v628_v47, 0.0  ;;  %v920_v52 = vmax.f32 %v657_v48, 0.0 }
  0xed   : > { %v933_v63 = vmax.f32 %v573_v53, 0.0  ;;  %v934_v0 = vmax.f32 %v602_v54, 0.0 }
  0xee   : > { %v1000_v55 = vadd.f32 %v920_v52, %v919_v51 }
  0xef   : > { %v991_v6 = vadd.f32 %v934_v0, %v933_v63 }
  0xf1   : > { %v630_v56 = vpop.f32.mrf.mxu2  ;;  %v659_v57 = vpop.f32.mrf.mxu3  ;;  %1001 = vadd.xlane.f32.xlu2 %v1000_v55 }
  0xf2   : > { %v631_v58 = vadd.f32 %v630_v56, %v1958_v42  ;;  %v660_v59 = vadd.f32 %v659_v57, %v1958_v42  ;;  %v575_v61 = vpop.f32.mrf.mxu0  ;;  %v604_v62 = vpop.f32.mrf.mxu1 }
  0xf3   : > { %v576_v3 = vadd.f32 %v575_v61, %v1966_v60  ;;  %v605_v4 = vadd.f32 %v604_v62, %v1966_v60 }
  0xf4   : > { %v935_v1 = vmax.f32 %v631_v58, 0.0  ;;  %v936_v2 = vmax.f32 %v660_v59, 0.0 }
  0xf5   : > { %v949_v9 = vmax.f32 %v576_v3, 0.0  ;;  %v950_v10 = vmax.f32 %v605_v4, 0.0 }
  0xf6   : > { %v1003_v5 = vadd.f32 %v936_v2, %v935_v1 }
  0xf7   : > { %v994_v23 = vadd.f32 %v950_v10, %v949_v9 }
  0xf8   : > { %1004 = vadd.xlane.f32.xlu1 %v1003_v5 }
  0xf9   : > { %v633_v7 = vpop.f32.mrf.mxu2  ;;  %v662_v8 = vpop.f32.mrf.mxu3  ;;  %992 = vadd.xlane.f32.xlu2 %v991_v6 }
  0xfa   : > { %v634_v11 = vadd.f32 %v633_v7, %v1966_v60  ;;  %v663_v12 = vadd.f32 %v662_v8, %v1966_v60  ;;  %v682_v13 = vpop.f32.mrf.mxu0  ;;  %v711_v14 = vpop.f32.mrf.mxu1 }
  0xfb   : > { %v683_v15 = vadd.f32 %v682_v13, %v1950_v21  ;;  %v712_v16 = vadd.f32 %v711_v14, %v1950_v21 }
  0xfc   : > { %v951_v17 = vmax.f32 %v634_v11, 0.0  ;;  %v952_v18 = vmax.f32 %v663_v12, 0.0 }
  0xfd   : > { %v905_v19 = vmax.f32 %v683_v15, 0.0  ;;  %v906_v20 = vmax.f32 %v712_v16, 0.0 }
  0xfe   : > { %v1006_v22 = vadd.f32 %v952_v18, %v951_v17 }
  0xff   : > { %v1009_v24 = vadd.f32 %v906_v20, %v905_v19 }
 0x100   : > { %1007 = vadd.xlane.f32.xlu0 %v1006_v22  ;;  %995 = vadd.xlane.f32.xlu1 %v994_v23 }
 0x101   : > { %v740_v25 = vpop.f32.mrf.mxu2  ;;  %v769_v26 = vpop.f32.mrf.mxu3  ;;  %1010 = vadd.xlane.f32.xlu2 %v1009_v24 }
 0x102   : > { %v741_v27 = vadd.f32 %v740_v25, %v1950_v21  ;;  %v770_v28 = vadd.f32 %v769_v26, %v1950_v21  ;;  %v685_v29 = vpop.f32.mrf.mxu0  ;;  %v714_v30 = vpop.f32.mrf.mxu1 }
 0x103   : > { %v686_v31 = vadd.f32 %v685_v29, %v1956_v41  ;;  %v715_v32 = vadd.f32 %v714_v30, %v1956_v41 }
 0x104   : > { %v907_v33 = vmax.f32 %v741_v27, 0.0  ;;  %v908_v34 = vmax.f32 %v770_v28, 0.0 }
 0x105   : > { %v921_v35 = vmax.f32 %v686_v31, 0.0  ;;  %v922_v36 = vmax.f32 %v715_v32, 0.0 }
 0x106   : > { %v1021_v38 = vadd.f32 %v908_v34, %v907_v33 }
 0x107   : > { %v1012_v37 = vadd.f32 %v922_v36, %v921_v35 }
 0x109   : > { %v743_v39 = vpop.f32.mrf.mxu2  ;;  %v772_v40 = vpop.f32.mrf.mxu3  ;;  %1013 = vadd.xlane.f32.xlu0 %v1012_v37  ;;  %1022 = vadd.xlane.f32.xlu2 %v1021_v38 }
 0x10a   : > { %v744_v43 = vadd.f32 %v743_v39, %v1956_v41  ;;  %v773_v44 = vadd.f32 %v772_v40, %v1956_v41  ;;  %v688_v45 = vpop.f32.mrf.mxu0  ;;  %v717_v46 = vpop.f32.mrf.mxu1 }
 0x10b   : > { %v689_v47 = vadd.f32 %v688_v45, %v1958_v42  ;;  %v718_v48 = vadd.f32 %v717_v46, %v1958_v42 }
 0x10c   : > { %v923_v49 = vmax.f32 %v744_v43, 0.0  ;;  %v924_v50 = vmax.f32 %v773_v44, 0.0 }
 0x10d   : > { %v937_v51 = vmax.f32 %v689_v47, 0.0  ;;  %v938_v52 = vmax.f32 %v718_v48, 0.0 }
 0x10e   : > { %v1024_v53 = vadd.f32 %v924_v50, %v923_v49 }
 0x10f   : > { %v1015_v54 = vadd.f32 %v938_v52, %v937_v51 }
 0x111   : > { %v746_v55 = vpop.f32.mrf.mxu2  ;;  %v775_v56 = vpop.f32.mrf.mxu3  ;;  %1025 = vadd.xlane.f32.xlu0 %v1024_v53  ;;  %1016 = vadd.xlane.f32.xlu2 %v1015_v54 }
 0x112   : > { %v747_v57 = vadd.f32 %v746_v55, %v1958_v42  ;;  %v776_v58 = vadd.f32 %v775_v56, %v1958_v42  ;;  %v691_v59 = vpop.f32.mrf.mxu0  ;;  %v720_v61 = vpop.f32.mrf.mxu1 }
 0x113   : > { %v692_v0 = vadd.f32 %v691_v59, %v1966_v60  ;;  %v721_v1 = vadd.f32 %v720_v61, %v1966_v60 }
 0x114   : > { %v939_v62 = vmax.f32 %v747_v57, 0.0  ;;  %v940_v63 = vmax.f32 %v776_v58, 0.0 }
 0x115   : > { %v953_v9 = vmax.f32 %v692_v0, 0.0  ;;  %v954_v10 = vmax.f32 %v721_v1, 0.0 }
 0x116   : > { %v1027_v2 = vadd.f32 %v940_v63, %v939_v62 }
 0x117   : > { %v1018_v19 = vadd.f32 %v954_v10, %v953_v9 }
 0x119   : > { %v749_v3 = vpop.f32.mrf.mxu2  ;;  %v778_v4 = vpop.f32.mrf.mxu3  ;;  %1028 = vadd.xlane.f32.xlu2 %v1027_v2 }
 0x11a   : > { %v750_v5 = vadd.f32 %v749_v3, %v1966_v60  ;;  %v779_v6 = vadd.f32 %v778_v4, %v1966_v60  ;;  %v798_v7 = vpop.f32.mrf.mxu0  ;;  %v827_v8 = vpop.f32.mrf.mxu1 }
 0x11b   : > { %v799_v11 = vadd.f32 %v798_v7, %v1950_v21  ;;  %v828_v12 = vadd.f32 %v827_v8, %v1950_v21 }
 0x11c   : > { %v955_v13 = vmax.f32 %v750_v5, 0.0  ;;  %v956_v14 = vmax.f32 %v779_v6, 0.0 }
 0x11d   : > { %v909_v15 = vmax.f32 %v799_v11, 0.0  ;;  %v910_v16 = vmax.f32 %v828_v12, 0.0 }
 0x11e   : > { %v1030_v17 = vadd.f32 %v956_v14, %v955_v13 }
 0x11f   : > { %v1033_v18 = vadd.f32 %v910_v16, %v909_v15 }
 0x120   : > { %1031 = vadd.xlane.f32.xlu1 %v1030_v17 }
 0x121   : > { %v856_v20 = vpop.f32.mrf.mxu2  ;;  %v885_v22 = vpop.f32.mrf.mxu3  ;;  %1034 = vadd.xlane.f32.xlu0 %v1033_v18  ;;  %1019 = vadd.xlane.f32.xlu2 %v1018_v19 }
 0x122   : > { %v857_v23 = vadd.f32 %v856_v20, %v1950_v21  ;;  %v886_v24 = vadd.f32 %v885_v22, %v1950_v21  ;;  %v801_v25 = vpop.f32.mrf.mxu0  ;;  %v830_v26 = vpop.f32.mrf.mxu1 }
 0x123   : > { %v802_v27 = vadd.f32 %v801_v25, %v1956_v41  ;;  %v831_v28 = vadd.f32 %v830_v26, %v1956_v41 }
 0x124   : > { %v911_v29 = vmax.f32 %v857_v23, 0.0  ;;  %v912_v30 = vmax.f32 %v886_v24, 0.0 }
 0x125   : > { %v925_v31 = vmax.f32 %v802_v27, 0.0  ;;  %v926_v32 = vmax.f32 %v831_v28, 0.0 }
 0x126   : > { %v1045_v33 = vadd.f32 %v912_v30, %v911_v29 }
 0x127   : > { %v1036_v34 = vadd.f32 %v926_v32, %v925_v31  ;;  %v1127_v31 = vld [vmem:[#allocation5 + $0x18] sm:$0xff]  ;;  %v1126_v32 = vld [vmem:[#allocation5 + $0x10] sm:$0xff] }
 0x128   : > { %1046 = vadd.xlane.f32.xlu1 %v1045_v33  ;;  %1148 = vmatpush.msra.mxu0 %v1127_v31 }
 0x129   : > { %v859_v35 = vpop.f32.mrf.mxu2  ;;  %v888_v36 = vpop.f32.mrf.mxu3  ;;  %1037 = vadd.xlane.f32.xlu2 %v1036_v34 }
 0x12a   : > { %v860_v37 = vadd.f32 %v859_v35, %v1956_v41  ;;  %v889_v21 = vadd.f32 %v888_v36, %v1956_v41  ;;  %v804_v38 = vpop.f32.mrf.mxu0  ;;  %v833_v39 = vpop.f32.mrf.mxu1  ;;  %v1125_v35 = vld [vmem:[#allocation5 + $0x8] sm:$0xff]  ;;  %1149 = vmatpush.msra.mxu0 %v1126_v32 }
 0x12b   : > { %v805_v40 = vadd.f32 %v804_v38, %v1958_v42  ;;  %v834_v43 = vadd.f32 %v833_v39, %v1958_v42  ;;  %v1124_v38 = vld [vmem:[#allocation5] sm:$0xff] }
 0x12c   : > { %v927_v44 = vmax.f32 %v860_v37, 0.0  ;;  %v928_v45 = vmax.f32 %v889_v21, 0.0  ;;  %1150 = vmatpush.msra.mxu0 %v1125_v35 }
 0x12d   : > { %v941_v46 = vmax.f32 %v805_v40, 0.0  ;;  %v942_v47 = vmax.f32 %v834_v43, 0.0 }
 0x12e   : > { %v1048_v48 = vadd.f32 %v928_v45, %v927_v44  ;;  %1151 = vmatpush.msra.mxu0 %v1124_v38 }
 0x12f   : > { %v1039_v49 = vadd.f32 %v942_v47, %v941_v46 }
 0x130   : > { %1049 = vadd.xlane.f32.xlu0 %v1048_v48 }
 0x131   : > { %v862_v50 = vpop.f32.mrf.mxu2  ;;  %v891_v51 = vpop.f32.mrf.mxu3  ;;  %1040 = vadd.xlane.f32.xlu1 %v1039_v49 }
 0x132   : > { %v863_v52 = vadd.f32 %v862_v50, %v1958_v42  ;;  %v892_v41 = vadd.f32 %v891_v51, %v1958_v42  ;;  %v807_v53 = vpop.f32.mrf.mxu0  ;;  %v836_v54 = vpop.f32.mrf.mxu1 }
 0x133   : > { %v808_v55 = vadd.f32 %v807_v53, %v1966_v60  ;;  %v837_v56 = vadd.f32 %v836_v54, %v1966_v60 }
 0x134   : > { %v943_v57 = vmax.f32 %v863_v52, 0.0  ;;  %v944_v58 = vmax.f32 %v892_v41, 0.0  ;;  %v963_v59 = vpop.xlane.xlu2 %962 }
 0x135   : > { %v957_v61 = vmax.f32 %v808_v55, 0.0  ;;  %v958_v62 = vmax.f32 %v837_v56, 0.0 }
 0x136   : > { %v1051_v63 = vadd.f32 %v944_v58, %v943_v57 }
 0x137   : > { %v1042_v0 = vadd.f32 %v958_v62, %v957_v61 }
 0x138   : > { %1052 = vadd.xlane.f32.xlu0 %v1051_v63 }
 0x139   : > { %v865_v1 = vpop.f32.mrf.mxu2  ;;  %v894_v2 = vpop.f32.mrf.mxu3  ;;  %1043 = vadd.xlane.f32.xlu2 %v1042_v0 }
 0x13a   : > { %v866_v3 = vadd.f32 %v865_v1, %v1966_v60  ;;  %v895_v42 = vadd.f32 %v894_v2, %v1966_v60 }
 0x13c   : > { %v959_v4 = vmax.f32 %v866_v3, 0.0  ;;  %v960_v5 = vmax.f32 %v895_v42, 0.0  ;;  %v975_v6 = vpop.xlane.xlu2 %974 }
 0x13d   : > { %v1058_v7 = vsel %vm1057_vm2, %v963_v59, %v975_v6 }
 0x13e   : > { %v1054_v8 = vadd.f32 %v960_v5, %v959_v4 }
 0x140   : > { %1055 = vadd.xlane.f32.xlu0 %v1054_v8 }
 0x144   : > { %v966_v9 = vpop.xlane.xlu2 %965  ;;  %v969_v15 = vpop.xlane.xlu1 %968 }
 0x14c   : > { %v978_v10 = vpop.xlane.xlu2 %977  ;;  %v972_v16 = vpop.xlane.xlu0 %971 }
 0x14d   : > { %v1059_v11 = vsel %vm1057_vm2, %v966_v9, %v978_v10 }
 0x153   : > { %v984_v18 = vpop.xlane.xlu1 %983 }
 0x154   : > { %v981_v12 = vpop.xlane.xlu2 %980  ;;  %v987_v19 = vpop.xlane.xlu0 %986  ;;  %v1061_v57 = vsel %vm1057_vm2, %v972_v16, %v984_v18 }
 0x155   : > { %v1063_v34 = vsel %vm1062_vm3, %v1058_v7, %v987_v19  ;;  %v1060_v52 = vsel %vm1057_vm2, %v969_v15, %v981_v12  ;;  %v1415_v7 = vld [vmem:[%s2091_s4] ss:$0 sm:$0xff] }
 0x15b   : > { %v999_v20 = vpop.xlane.xlu1 %998 }
 0x15c   : > { %v990_v13 = vpop.xlane.xlu2 %989  ;;  %v1068_v36 = vsel %vm1067_vm4, %v1063_v34, %v999_v20 }
 0x15d   : > { %v1064_v45 = vsel %vm1062_vm3, %v1059_v11, %v990_v13 }
 0x164   : > { %v1002_v14 = vpop.xlane.xlu2 %1001 }
 0x165   : > { %v1069_v46 = vsel %vm1067_vm4, %v1064_v45, %v1002_v14 }
 0x16b   : > { %v1005_v24 = vpop.xlane.xlu1 %1004 }
 0x16c   : > { %v993_v17 = vpop.xlane.xlu2 %992 }
 0x16d   : > { %v1065_v53 = vsel %vm1062_vm3, %v1060_v52, %v993_v17 }
 0x16e   : > { %v1070_v54 = vsel %vm1067_vm4, %v1065_v53, %v1005_v24 }
 0x173   : > { %v1008_v23 = vpop.xlane.xlu0 %1007  ;;  %v996_v27 = vpop.xlane.xlu1 %995 }
 0x174   : > { %v1011_v60 = vpop.xlane.xlu2 %1010  ;;  %v1066_v59 = vsel %vm1062_vm3, %v1061_v57, %v996_v27 }
 0x175   : > { %v1073_v21 = vsel %vm1072_vm5, %v1068_v36, %v1011_v60  ;;  %v1071_v0 = vsel %vm1067_vm4, %v1066_v59, %v1008_v23 }
 0x17c   : > { %v1023_v22 = vpop.xlane.xlu2 %1022  ;;  %v1014_v26 = vpop.xlane.xlu0 %1013 }
 0x17d   : > { %v1078_v39 = vsel %vm1077_vm6, %v1073_v21, %v1023_v22  ;;  %v1074_v48 = vsel %vm1072_vm5, %v1069_v46, %v1014_v26 }
 0x184   : > { %v1017_v25 = vpop.xlane.xlu2 %1016  ;;  %v1026_v29 = vpop.xlane.xlu0 %1025 }
 0x185   : > { %v1079_v49 = vsel %vm1077_vm6, %v1074_v48, %v1026_v29  ;;  %v1075_v56 = vsel %vm1072_vm5, %v1070_v54, %v1017_v25 }
 0x18c   : > { %v1029_v28 = vpop.xlane.xlu2 %1028 }
 0x18d   : > { %v1080_v58 = vsel %vm1077_vm6, %v1075_v56, %v1029_v28 }
 0x193   : > { %v1032_v30 = vpop.xlane.xlu1 %1031 }
 0x194   : > { %v1020_v33 = vpop.xlane.xlu2 %1019  ;;  %v1035_v37 = vpop.xlane.xlu0 %1034 }
 0x195   : > { %v1083_v40 = vsel %vm1082_vm7, %v1078_v39, %v1035_v37  ;;  %v1076_v1 = vsel %vm1072_vm5, %v1071_v0, %v1020_v33 }
 0x196   : > { %v1081_v3 = vsel %vm1077_vm6, %v1076_v1, %v1032_v30 }
 0x19b   : > { %v1047_v43 = vpop.xlane.xlu1 %1046 }
 0x19c   : > { %v1088_v44 = vsel %vm1087_vm8, %v1083_v40, %v1047_v43  ;;  %v1038_v47 = vpop.xlane.xlu2 %1037 }
 0x19d   : > { %1092 = vxpose.xlu1.b32.start [1/4] (short) (narrow) %v1088_v44, 8  ;;  %v1084_v50 = vsel %vm1082_vm7, %v1079_v49, %v1038_v47 }
 0x1a3   : > { %v1050_v51 = vpop.xlane.xlu0 %1049 }
 0x1a4   : > { %v1089_v41 = vsel %vm1087_vm8, %v1084_v50, %v1050_v51  ;;  %v1041_v55 = vpop.xlane.xlu1 %1040 }
 0x1a5   : > { %1093 = vxpose.xlu1.b32.cont [2/4] (short) (narrow) %v1089_v41, 8  ;;  %v1085_v61 = vsel %vm1082_vm7, %v1080_v58, %v1041_v55 }
 0x1ab   : > { %v1053_v62 = vpop.xlane.xlu0 %1052 }
 0x1ac   : > { %v1090_v63 = vsel %vm1087_vm8, %v1085_v61, %v1053_v62  ;;  %v1044_v2 = vpop.xlane.xlu2 %1043 }
 0x1ad   : > { %1094 = vxpose.xlu1.b32.cont [3/4] (short) (narrow) %v1090_v63, 8  ;;  %v1086_v42 = vsel %vm1082_vm7, %v1081_v3, %v1044_v2 }
 0x1b3   : > { %v1056_v4 = vpop.xlane.xlu0 %1055 }
 0x1b4   : > { %v1091_v5 = vsel %vm1087_vm8, %v1086_v42, %v1056_v4 }
 0x1b5   : > { %1095 = vxpose.xlu1.b32.end [4/4] (short) (narrow) %v1091_v5, 8 }
 0x241   : > { %v1108_v6 = vpop.trf.xlu1 }
 0x242   : > { %1342 = vmatmul.msk.f32.vlgmr.msra.gmra.mxu0 %vm1132_vm9, %v1108_v6 }
 0x2bf   : > { %v1153_v8 = vpop.f32.mrf.mxu0 }
 0x2c0   : > { %v1154_v9 = vadd.f32 %v1415_v7, %v1153_v8 }
 0x2c2   : > { %1156 = vst [vmem:[%s261_s15] sm:$0xff] %v1154_v9 }
 0x2c3   : > { %1503 = shalt.err (!%p1500_p10)
}
 0x2c4   : > { %1356 = dma.vmem_to_hbm [thread:$0]  (%p1653_p7), %s1171_s17, 128, %s1173_s23, %s1158_s14  }
 0x2c5 PF: > { %s1184_s30 = sand.u32 1, %s1534_s18   ;;  %p2102_p12 = scmp.ge.s32.totalorder %s1546_s21, 2 }
 0x2c6   : > { %s1185_s29 = scalar_lea.sflag [#allocation4], %s1184_s30 }
 0x2c7   : > { %p1367_p13 = pnand %p2102_p12, %p1619_p6 }
 0x2c9   : > { %p1368_p0 = pneg %p1367_p13 }
 0x2cb   : > { %1529 = dma.done.wait (%p1368_p0), %s1185_s29, 128  }
 0x2cc   : > { %1531 = vsyncadd (%p1368_p0), %s1185_s29, 4294967168  ;;  %p19_p3 = scmp.ge.s32.totalorder %s1637_s7, 4   ;;  %s2103_s18 = smov %s1538_s19 }
 0x2cd   : > { %s2104_s19 = smov %s1542_s20  ;;  %s2105_s20 = smov %s1649_s12 }
 0x2ce   : > { %s2106_s21 = smov %s1637_s7  ;;  %21 = sbr.rel (!%p19_p3) target bundleno = 8 (0x8), region = 89 }
 0x2d3   :  { %1191 = vsyncpa [#allocation3], 1 }
 0x2d4   :  { %1193 = vsyncpa [#allocation3 + $0x1], 1 }
 0x2d5   :  { %1194 = vsyncpa [#allocation6], 1 }
 0x2d6   :  { %1195 = vsyncpa [#allocation4], 1 }
 0x2d7   :  { %1197 = vsyncpa [#allocation4 + $0x1], 1 }

</bundles_post_ra>
